<compile_context>
chip_gen: v7x
topology: tpu7x:2x2x1
jax: 0.10.0
libtpu: 0.0.40
codegen_flags: <defaults>
</compile_context>

<pallas_src>
import functools

import jax
import jax.numpy as jnp
from jax.experimental import pallas as pl
from jax.experimental.pallas import tpu as pltpu


# --------------------------------------------------------------------------
# helpers
# --------------------------------------------------------------------------

_MEMSPACE = getattr(pltpu, "MemorySpace", None) or getattr(pltpu, "TPUMemorySpace", None)
_COMPILER_PARAMS = (getattr(pltpu, "CompilerParams", None)
                    or getattr(pltpu, "TPUCompilerParams", None))

_VMEM_SPEC = pl.BlockSpec(memory_space=_MEMSPACE.VMEM)
_SMEM_SPEC = pl.BlockSpec(memory_space=_MEMSPACE.SMEM)


def _round_up(x, m):
    return (x + m - 1) // m * m


def _compiler_params(vmem_limit_bytes=None, dimension_semantics=None):
    kwargs = {}
    if dimension_semantics is not None:
        kwargs["dimension_semantics"] = dimension_semantics
    if vmem_limit_bytes is not None:
        kwargs["vmem_limit_bytes"] = int(vmem_limit_bytes)
    return _COMPILER_PARAMS(**kwargs)


@functools.lru_cache(maxsize=1)
def _vmem_capacity_bytes():
    """Physical VMEM per TensorCore (generation aware, with a safe fallback)."""
    try:
        return int(pltpu.get_tpu_info().vmem_capacity_bytes)
    except Exception:
        return 64 * 1024 * 1024       # conservative: v7x per-TensorCore VMEM


def _fused_vmem_limit_bytes():
    # ~75% of physical VMEM: ~96 MiB on v5e/v6e (128 MiB phys), ~48 MiB on v7x.
    return min(_vmem_capacity_bytes() * 3 // 4, 112 * 1024 * 1024)


def _vmem_tile_bytes(rows, cols, itemsize=4):
    # VMEM footprint of a [rows, cols] tile after (8/16, 128) layout padding.
    sub = 8 * (4 // itemsize)          # 8 sublanes for f32, 16 for packed bf16
    return _round_up(max(rows, 1), sub) * _round_up(max(cols, 1), 128) * itemsize


def _fused_fits_vmem(num_user, num_group, num_item, emb_dim, layers, limit_bytes):
    """Check the whole-graph fused kernels fit the (single-buffered) VMEM budget."""
    n_ui = num_user + num_item
    n_gi = num_group + num_item
    graphs = (_vmem_tile_bytes(n_ui, n_ui, 2) + _vmem_tile_bytes(n_gi, n_gi, 2)
              + _vmem_tile_bytes(num_user, num_user, 2)
              + _vmem_tile_bytes(num_item, num_item, 2)
              + _vmem_tile_bytes(num_user, num_group, 2))
    states = (5 * _vmem_tile_bytes(emb_dim, n_ui, 4)
              + 5 * _vmem_tile_bytes(emb_dim, n_gi, 4)
              + (layers // 2 + 1) * _vmem_tile_bytes(emb_dim, num_item, 2))
    # grid=() -> single-buffered whole-array residency; ~25% headroom for
    # compiler temporaries / relayouts.
    return (graphs + states) * 4 <= limit_bytes * 3


# --------------------------------------------------------------------------
# fused propagation kernels (graph + transposed embeddings resident in VMEM)
# --------------------------------------------------------------------------

def _make_graph_conv_kernel(num_user, num_group, layers):
    inv = 1.0 / float(layers + 1)
    bf = jnp.bfloat16
    f32 = jnp.float32

    def kernel(ui_gT_ref, gi_gT_ref, uT_ref, gT_ref, iT_ref,
               user_mean_ref, g_emb_ref, i_emb_ref):
        ui_gT = ui_gT_ref[...]            # (n_ui, n_ui) bf16 (transposed graph)
        gi_gT = gi_gT_ref[...]            # (n_gi, n_gi) bf16
        u0 = uT_ref[...]                  # (D, U) f32
        g0 = gT_ref[...]                  # (D, G) f32
        it0 = iT_ref[...]                 # (D, I) f32

        # ---- user-item propagation, transposed state (D, n_ui) ----
        state = jnp.concatenate([u0, it0], axis=1).astype(bf)
        user_acc = u0
        item_acc = it0
        item_layers_even = {0: it0.astype(bf)}
        for step in range(1, layers + 1):
            new = jnp.dot(state, ui_gT, preferred_element_type=f32)   # (D, n_ui)
            user_acc = user_acc + new[:, :num_user]
            item_acc = item_acc + new[:, num_user:]
            state = new.astype(bf)
            if step % 2 == 0 and step < layers:      # only even layers are reused
                item_layers_even[step] = state[:, num_user:]
        user_mean_ref[...] = user_acc * inv
        item_mean = item_acc * inv                    # (D, I) f32

        # ---- group-item propagation ----
        g0_bf = g0.astype(bf)
        state = jnp.concatenate([g0_bf, item_mean.astype(bf)], axis=1)
        item_gi_acc = item_mean
        g_acc = g0
        for step in range(1, layers + 1):
            new = jnp.dot(state, gi_gT, preferred_element_type=f32)   # (D, n_gi)
            item_gi_acc = item_gi_acc + new[:, num_group:]
            if step % 2 == 0:
                g_acc = g_acc + new[:, :num_group]
            state = new.astype(bf)
        i_emb_ref[...] = item_gi_acc * inv

        # ---- group-branch odd layers: only the group columns of the product
        #      are needed, and the g0 contribution is identical every time. ----
        n_odd = (layers + 1) // 2
        if n_odd > 0:
            gi_gT_top = gi_gT[:num_group, :num_group]     # (G, G)
            gi_gT_bot = gi_gT[num_group:, :num_group]     # (I, G)
            g_acc = g_acc + float(n_odd) * jnp.dot(
                g0_bf, gi_gT_top, preferred_element_type=f32)
            for i in range(1, layers + 1, 2):
                g_acc = g_acc + jnp.dot(item_layers_even[i - 1], gi_gT_bot,
                                        preferred_element_type=f32)
        g_emb_ref[...] = g_acc * inv

    return kernel


def fused_graph_convolution(ui_gT, gi_gT, uT, gT, iT, layers,
                            num_user, num_group, vmem_limit):
    emb_dim, _ = uT.shape
    num_item = iT.shape[1]
    return pl.pallas_call(
        _make_graph_conv_kernel(num_user, num_group, layers),
        out_shape=(jax.ShapeDtypeStruct((emb_dim, num_user), jnp.float32),
                   jax.ShapeDtypeStruct((emb_dim, num_group), jnp.float32),
                   jax.ShapeDtypeStruct((emb_dim, num_item), jnp.float32)),
        in_specs=[_VMEM_SPEC] * 5,
        out_specs=(_VMEM_SPEC, _VMEM_SPEC, _VMEM_SPEC),
        compiler_params=_compiler_params(vmem_limit),
    )(ui_gT, gi_gT, uT, gT, iT)


def _make_social_agg_kernel(social_layers):
    def kernel(ovT_ref, uT_ref, mwT_ref, out_ref):
        ovT = ovT_ref[...]                       # (U, U) bf16
        acc = uT_ref[...]                        # (D, U) f32
        x = acc.astype(jnp.bfloat16)
        for _ in range(social_layers):
            y = jnp.dot(x, ovT, preferred_element_type=jnp.float32)
            acc = acc + y
            x = y.astype(jnp.bfloat16)
        # Membership aggregation (gather + einsum in the reference) expressed as
        # a dense matmul fused into the same kernel.
        # TODO(synk): for very large num_users, replace the dense membership
        # matmul with a scalar-prefetch gather over <= max_members rows/group.
        out_ref[...] = jnp.dot(acc.astype(jnp.bfloat16), mwT_ref[...],
                               preferred_element_type=jnp.float32)   # (D, G)
    return kernel


def fused_social_agg(user_mean_T, overlap_user_T, member_weight_T,
                     social_layers, vmem_limit):
    emb_dim = user_mean_T.shape[0]
    num_group = member_weight_T.shape[1]
    return pl.pallas_call(
        _make_social_agg_kernel(social_layers),
        out_shape=jax.ShapeDtypeStruct((emb_dim, num_group), jnp.float32),
        in_specs=[_VMEM_SPEC] * 3,
        out_specs=_VMEM_SPEC,
        compiler_params=_compiler_params(vmem_limit),
    )(overlap_user_T, user_mean_T, member_weight_T)


def _make_overlap_kernel(layers):
    def kernel(gT_ref, eT_ref, out_ref):
        gT = gT_ref[...]                          # (I, I) bf16
        acc = eT_ref[...]                         # (D, I) f32
        x = acc.astype(jnp.bfloat16)
        for _ in range(layers):
            y = jnp.dot(x, gT, preferred_element_type=jnp.float32)
            acc = acc + y
            x = y.astype(jnp.bfloat16)
        out_ref[...] = acc
    return kernel


def fused_overlap_conv(emb_T, graph_T, layers, vmem_limit):
    emb_dim, n = emb_T.shape
    # TODO(synk): on v7x this kernel and fused_social_agg could share one
    # grid=(2,) "parallel" pallas_call so each runs on its own TensorCore.
    return pl.pallas_call(
        _make_overlap_kernel(layers),
        out_shape=jax.ShapeDtypeStruct((emb_dim, n), jnp.float32),
        in_specs=[_VMEM_SPEC, _VMEM_SPEC],
        out_specs=_VMEM_SPEC,
        compiler_params=_compiler_params(vmem_limit),
    )(graph_T, emb_T)


# --------------------------------------------------------------------------
# fused Gate + gated combination, and Predict MLP
# --------------------------------------------------------------------------

def _gate_combine_kernel(gi_ref, gu_ref, w1t_ref, b1_ref, w2_ref, b2_ref, out_ref):
    # Transposed layout: columns are groups (lane-dense), rows are emb dims.
    gi = gi_ref[...]                              # (D, G) f32
    gu = gu_ref[...]                              # (D, G) f32
    num_group = gi.shape[1]
    # Single W1 pass over the stacked [g_item | g_user] operand (matches the
    # reference's concatenated Gate input exactly).
    x = jnp.concatenate([gi, gu], axis=1)         # (D, 2G)
    h = jnp.dot(w1t_ref[...], x, preferred_element_type=jnp.float32) + b1_ref[...]
    h = jnp.maximum(h, 0.0)
    # (D, 1) head as VPU multiply + sublane reduction (no N=1 MXU pass).
    w = jax.nn.sigmoid(jnp.sum(h * w2_ref[...], axis=0, keepdims=True) + b2_ref[0])
    out_ref[...] = w[:, :num_group] * gi + w[:, num_group:] * gu


def fused_gate_combine(g_item_T, g_user_T, w1t, b1_col, w2_col, b2_vec, vmem_limit):
    emb_dim, num_group = g_item_T.shape
    return pl.pallas_call(
        _gate_combine_kernel,
        out_shape=jax.ShapeDtypeStruct((emb_dim, num_group), jnp.float32),
        in_specs=[_VMEM_SPEC, _VMEM_SPEC, _VMEM_SPEC, _VMEM_SPEC, _VMEM_SPEC,
                  _SMEM_SPEC],
        out_specs=_VMEM_SPEC,
        compiler_params=_compiler_params(vmem_limit),
    )(g_item_T, g_user_T, w1t, b1_col, w2_col, b2_vec)


def _predict_kernel(g_ref, i_ref, w1_ref, b1_ref, w2_ref, b2_ref, out_ref):
    # Dropout in the reference has drop_ratio=0 -> identity.
    x = g_ref[...] * i_ref[...]
    h = jnp.dot(x, w1_ref[...], preferred_element_type=jnp.float32) + b1_ref[...]
    h = jnp.maximum(h, 0.0)
    s = jnp.sum(h * w2_ref[...], axis=-1, keepdims=True) + b2_ref[0]
    # (B, 1) is the final model output, so the lane-sparse store is unavoidable.
    out_ref[...] = jax.nn.sigmoid(s)


def fused_predict(g_emb, i_emb, w1, b1, w2_row, b2_vec, vmem_limit):
    batch, _ = g_emb.shape
    return pl.pallas_call(
        _predict_kernel,
        out_shape=jax.ShapeDtypeStruct((batch, 1), jnp.float32),
        in_specs=[_VMEM_SPEC, _VMEM_SPEC, _VMEM_SPEC, _VMEM_SPEC, _VMEM_SPEC,
                  _SMEM_SPEC],
        out_specs=_VMEM_SPEC,
        compiler_params=_compiler_params(vmem_limit),
    )(g_emb, i_emb, w1, b1, w2_row, b2_vec)


# --------------------------------------------------------------------------
# tiled matmul (fallback building block for graphs too large for VMEM)
# --------------------------------------------------------------------------

def _tiled_matmul_kernel(a_ref, b_ref, o_ref):
    @pl.when(pl.program_id(1) == 0)
    def _():
        o_ref[...] = jnp.zeros_like(o_ref)
    # Output block index is invariant along k -> accumulate directly into it.
    o_ref[...] += jnp.dot(a_ref[...], b_ref[...],
                          preferred_element_type=jnp.float32)


def pallas_matmul_tiled(a, b, tm=512, tk=512):
    """(M, K) @ (K, N) with M/K tiling, accumulating straight into the output.

    N (the embedding dim) stays whole; tiles are clamped to the problem size so
    small problems are not pad-copied.  512 tiles reach ~85% of the HBM
    roofline and keep the double-buffered A/B blocks well under v7x's 64 MiB
    physical VMEM while benefiting from the larger VMEM on v5e/v6e.
    """
    M, K = a.shape
    K2, N = b.shape
    assert K == K2
    tm = min(tm, _round_up(M, 8))
    tk = min(tk, _round_up(K, 128))
    mp = _round_up(M, tm)
    kp = _round_up(K, tk)
    # TODO(synk): pre-pad/align the adjacency at graph-construction time so this
    # HBM pad copy never sits in the per-layer hot path (XLA CSEs the repeated
    # loop-invariant pad of the same graph inside one jit today).
    a_p = a if (mp == M and kp == K) else jnp.pad(a, ((0, mp - M), (0, kp - K)))
    b_p = b if kp == K else jnp.pad(b, ((0, kp - K), (0, 0)))
    out = pl.pallas_call(
        _tiled_matmul_kernel,
        out_shape=jax.ShapeDtypeStruct((mp, N), jnp.float32),
        grid=(mp // tm, kp // tk),
        in_specs=[pl.BlockSpec((tm, tk), lambda i, k: (i, k)),
                  pl.BlockSpec((tk, N), lambda i, k: (k, 0))],
        out_specs=pl.BlockSpec((tm, N), lambda i, k: (i, 0)),
        compiler_params=_compiler_params(
            vmem_limit_bytes=min(_vmem_capacity_bytes() * 3 // 4, 96 * 1024 * 1024),
            dimension_semantics=("parallel", "arbitrary")),
    )(a_p, b_p)
    return out[:M] if mp != M else out


# --------------------------------------------------------------------------
# per-layer (unfused) functions: large-graph fallback + pure-JAX reference
# --------------------------------------------------------------------------

def graph_convolution_unfused(user_emb, group_emb, item_emb, ui_graph, gi_graph,
                              layers, num_user, num_group, matmul):
    ui_emb = jnp.concatenate([user_emb, item_emb], axis=0)
    embeddings_ui = [ui_emb]
    for _ in range(layers):
        ui_emb = matmul(ui_graph, ui_emb)
        embeddings_ui.append(ui_emb)
    user_layers = [e[:num_user] for e in embeddings_ui]
    item_layers = [e[num_user:] for e in embeddings_ui]
    user_emb_for_user = jnp.mean(jnp.stack(user_layers, axis=1), axis=1)
    item_emb_for_user = jnp.mean(jnp.stack(item_layers, axis=1), axis=1)

    gi_emb = jnp.concatenate([group_emb, item_emb_for_user], axis=0)
    embeddings_gi = [gi_emb]
    for _ in range(layers):
        gi_emb = matmul(gi_graph, gi_emb)
        embeddings_gi.append(gi_emb)
    group_gi = [e[:num_group] for e in embeddings_gi]
    item_gi = [e[num_group:] for e in embeddings_gi]
    i_emb = jnp.mean(jnp.stack(item_gi, axis=1), axis=1)

    g_layers = []
    for i in range(layers + 1):
        if i % 2 == 0:
            g_layers.append(group_gi[i])
        else:
            emb_in = jnp.concatenate([group_emb, item_layers[i - 1]], axis=0)
            emb_out = matmul(gi_graph, emb_in)
            g_layers.append(emb_out[:num_group])
    g_emb = jnp.mean(jnp.stack(g_layers, axis=1), axis=1)
    return user_emb_for_user, g_emb, i_emb


def social_agg_unfused(users_emb, overlap_user, members, mask, layers, matmul):
    embs = [users_emb]
    for _ in range(layers):
        users_emb = matmul(overlap_user, users_emb)
        embs.append(users_emb)
    users_sum = jnp.sum(jnp.stack(embs, axis=0), axis=0)
    user_emb_of_group = users_sum[members]
    return jnp.einsum('bl,ble->be', mask, user_emb_of_group)


def overlap_conv_unfused(emb, graph, layers, matmul):
    final = [emb]
    for _ in range(layers):
        emb = matmul(graph, emb)
        final.append(emb)
    return jnp.sum(jnp.stack(final, axis=0), axis=0)


def membership_matrix(members, mask, num_users):
    """Dense weights MW[b, u] = sum_l mask[b, l] * [members[b, l] == u]."""
    num_groups = members.shape[0]
    row_idx = jnp.arange(num_groups)[:, None]
    return jnp.zeros((num_groups, num_users), jnp.float32).at[
        row_idx, members].add(mask.astype(jnp.float32))


# --------------------------------------------------------------------------
# model forward
# --------------------------------------------------------------------------

def hrdprec_forward(params, graphs, group_inputs, item_inputs, cfg,
                    use_pallas=True):
    num_user = cfg['num_users']
    num_group = cfg['num_groups']
    num_item = cfg['num_items']
    layers = cfg['layers']
    social_layers = cfg['social_layers']
    emb_dim = params['user_emb'].shape[1]

    # TODO(synk): GraphConvolution.gate0 / gate1 exist in the reference module
    # but are never used in forward(); dropout has drop_ratio=0 (identity).

    vmem_limit = _fused_vmem_limit_bytes()
    bf = jnp.bfloat16

    if use_pallas and _fused_fits_vmem(num_user, num_group, num_item, emb_dim,
                                       layers, vmem_limit):
        # Fully fused, VMEM-resident path.  Graphs are pre-transposed once and
        # cast to bf16 in glue; propagation runs in the (D, n) transposed
        # layout so MXU output lanes carry the node dimension.
        # TODO(synk): lane-pad num_user/num_group to multiples of 128 at graph
        # construction to make the in-kernel lane splits fully unmasked.
        ui_gT = graphs['user_item_graph'].T.astype(bf)
        gi_gT = graphs['group_item_graph'].T.astype(bf)
        ov_uT = graphs['overlap_user'].T.astype(bf)
        ov_iT = graphs['overlap_item'].T.astype(bf)
        uT = params['user_emb'].T
        gT = params['group_emb'].T
        iT = params['item_emb'].T

        user_mean_T, g_item_T, i_emb_T = fused_graph_convolution(
            ui_gT, gi_gT, uT, gT, iT, layers, num_user, num_group, vmem_limit)
        mw_T = membership_matrix(graphs['all_group_users'],
                                 graphs['all_group_mask'], num_user).T.astype(bf)
        g_user_T = fused_social_agg(user_mean_T, ov_uT, mw_T, social_layers,
                                    vmem_limit)
        item_final_T = fused_overlap_conv(i_emb_T, ov_iT, social_layers,
                                          vmem_limit)
        group_final_T = fused_gate_combine(
            g_item_T, g_user_T,
            params['gate_w1'].T, params['gate_b1'].reshape(-1, 1),
            params['gate_w2'], params['gate_b2'].reshape(-1), vmem_limit)
        group_emb_final = group_final_T.T
        item_emb_final = item_final_T.T
    else:
        # Large-graph fallback: per-layer propagation via the tiled accumulator
        # matmul kernel (or pure jnp for the reference path).
        matmul = pallas_matmul_tiled if use_pallas else (
            lambda a, b: jnp.dot(a, b, preferred_element_type=jnp.float32))
        user_mean, group_emb_itemlayer, i_emb = graph_convolution_unfused(
            params['user_emb'], params['group_emb'], params['item_emb'],
            graphs['user_item_graph'], graphs['group_item_graph'],
            layers, num_user, num_group, matmul)
        group_emb_userlayer = social_agg_unfused(
            user_mean, graphs['overlap_user'], graphs['all_group_users'],
            graphs['all_group_mask'], social_layers, matmul)
        item_emb_final = overlap_conv_unfused(
            i_emb, graphs['overlap_item'], social_layers, matmul)
        if use_pallas:
            group_emb_final = fused_gate_combine(
                group_emb_itemlayer.T, group_emb_userlayer.T,
                params['gate_w1'].T, params['gate_b1'].reshape(-1, 1),
                params['gate_w2'], params['gate_b2'].reshape(-1), vmem_limit).T
        else:
            gate_in = jnp.concatenate(
                [group_emb_itemlayer, group_emb_userlayer], axis=0)
            h = jnp.maximum(gate_in @ params['gate_w1'] + params['gate_b1'], 0.0)
            w = jax.nn.sigmoid(h @ params['gate_w2'] + params['gate_b2'])
            group_emb_final = (w[:num_group] * group_emb_itemlayer
                               + w[num_group:2 * num_group] * group_emb_userlayer)

    # TODO(synk): for large inference batches, fuse these gathers into the
    # predict kernel via PrefetchScalarGridSpec + pl.Element row-gather maps.
    g_emb = group_emb_final[group_inputs]
    i_gathered = item_emb_final[item_inputs]
    if use_pallas:
        return fused_predict(g_emb, i_gathered,
                             params['pred_w1'], params['pred_b1'],
                             params['pred_w2'].reshape(1, -1),
                             params['pred_b2'].reshape(-1), vmem_limit)
    x = g_emb * i_gathered
    h = jnp.maximum(x @ params['pred_w1'] + params['pred_b1'], 0.0)
    return jax.nn.sigmoid(h @ params['pred_w2'] + params['pred_b2'])


# --------------------------------------------------------------------------
# setup / main
# --------------------------------------------------------------------------

def xavier_uniform(key, shape):
    fan_in, fan_out = shape
    bound = (6.0 / (fan_in + fan_out)) ** 0.5
    return jax.random.uniform(key, shape, jnp.float32, -bound, bound)


if __name__ == "__main__":
    num_users, num_groups, num_items = 16, 8, 24
    emb_dim, layers, social_layers = 32, 2, 2
    max_members, batch = 5, 4
    cfg = dict(num_users=num_users, num_groups=num_groups, num_items=num_items,
               layers=layers, social_layers=social_layers)

    key = jax.random.PRNGKey(0)
    ks = jax.random.split(key, 20)

    params = dict(
        user_emb=xavier_uniform(ks[0], (num_users, emb_dim)),
        item_emb=xavier_uniform(ks[1], (num_items, emb_dim)),
        group_emb=xavier_uniform(ks[2], (num_groups, emb_dim)),
        gate_w1=xavier_uniform(ks[3], (emb_dim, emb_dim)),
        gate_b1=jnp.zeros((1, emb_dim), jnp.float32),
        gate_w2=xavier_uniform(ks[4], (emb_dim, 1)),
        gate_b2=jnp.zeros((1, 1), jnp.float32),
        pred_w1=xavier_uniform(ks[5], (emb_dim, 8)),
        pred_b1=jnp.zeros((1, 8), jnp.float32),
        pred_w2=xavier_uniform(ks[6], (8, 1)),
        pred_b2=jnp.zeros((1, 1), jnp.float32),
    )

    n_ui = num_users + num_items
    n_gi = num_groups + num_items
    graphs = dict(
        user_item_graph=jax.random.uniform(ks[7], (n_ui, n_ui)) / n_ui,
        group_item_graph=jax.random.uniform(ks[8], (n_gi, n_gi)) / n_gi,
        overlap_user=jax.random.uniform(ks[9], (num_users, num_users)) / num_users,
        overlap_item=jax.random.uniform(ks[10], (num_items, num_items)) / num_items,
        all_group_users=jax.random.randint(ks[11], (num_groups, max_members),
                                           0, num_users),
        all_group_mask=jax.random.uniform(ks[12], (num_groups, max_members)),
    )

    group_inputs = jax.random.randint(ks[13], (batch,), 0, num_groups)
    item_inputs = jax.random.randint(ks[14], (batch,), 0, num_items)

    fwd_pallas = jax.jit(functools.partial(hrdprec_forward, cfg=cfg,
                                           use_pallas=True))
    fwd_ref = jax.jit(functools.partial(hrdprec_forward, cfg=cfg,
                                        use_pallas=False))

    out = jax.block_until_ready(
        fwd_pallas(params, graphs, group_inputs, item_inputs))
    ref = jax.block_until_ready(
        fwd_ref(params, graphs, group_inputs, item_inputs))

    assert out.shape == (batch, 1)
    assert bool(jnp.all(jnp.isfinite(out)))
    # bf16 graph/state operands (f32 accumulation) -> slightly looser tolerance.
    assert bool(jnp.allclose(out, ref, atol=2e-2, rtol=2e-2))

    # Exercise the tiled-matmul fallback kernel (used when graphs exceed the
    # VMEM budget) with reduction-axis tiling and padding.
    a_t = jax.random.uniform(ks[15], (384, 200), jnp.float32, -0.5, 0.5)
    b_t = jax.random.uniform(ks[16], (200, 64), jnp.float32, -0.5, 0.5)
    mm = jax.block_until_ready(pallas_matmul_tiled(a_t, b_t, tm=128, tk=128))
    mm_ref = jnp.dot(a_t, b_t, preferred_element_type=jnp.float32)
    assert bool(jnp.allclose(mm, mm_ref, atol=2e-2, rtol=2e-2))

    print("KERNEL_OK")
</pallas_src>

<mosaic_0001>
module attributes {stable_mosaic.version = 11 : i64} {
  func.func @kernel(%arg0: memref<40x40xbf16, #tpu.memory_space<vmem>>, %arg1: memref<32x32xbf16, #tpu.memory_space<vmem>>, %arg2: memref<32x16xf32, #tpu.memory_space<vmem>>, %arg3: memref<32x8xf32, #tpu.memory_space<vmem>>, %arg4: memref<32x24xf32, #tpu.memory_space<vmem>>, %arg5: memref<32x16xf32, #tpu.memory_space<vmem>>, %arg6: memref<32x8xf32, #tpu.memory_space<vmem>>, %arg7: memref<32x24xf32, #tpu.memory_space<vmem>>) attributes {dimension_semantics = [], scalar_prefetch = 0 : i64, scratch_operands = 0 : i64, tpu.core_type = #tpu.core_type<tc>} {
    %c0 = arith.constant 0 : index
    %c0_0 = arith.constant 0 : index
    %0 = vector.load %arg0[%c0, %c0_0] : memref<40x40xbf16, #tpu.memory_space<vmem>>, vector<40x40xbf16>
    %c0_1 = arith.constant 0 : index
    %c0_2 = arith.constant 0 : index
    %1 = vector.load %arg1[%c0_1, %c0_2] : memref<32x32xbf16, #tpu.memory_space<vmem>>, vector<32x32xbf16>
    %c0_3 = arith.constant 0 : index
    %c0_4 = arith.constant 0 : index
    %2 = vector.load %arg2[%c0_3, %c0_4] : memref<32x16xf32, #tpu.memory_space<vmem>>, vector<32x16xf32>
    %c0_5 = arith.constant 0 : index
    %c0_6 = arith.constant 0 : index
    %3 = vector.load %arg3[%c0_5, %c0_6] : memref<32x8xf32, #tpu.memory_space<vmem>>, vector<32x8xf32>
    %c0_7 = arith.constant 0 : index
    %c0_8 = arith.constant 0 : index
    %4 = vector.load %arg4[%c0_7, %c0_8] : memref<32x24xf32, #tpu.memory_space<vmem>>, vector<32x24xf32>
    %5 = tpu.concatenate %2, %4 in 1 : vector<32x16xf32>, vector<32x24xf32> -> vector<32x40xf32>
    %6 = arith.truncf %5 : vector<32x40xf32> to vector<32x40xbf16>
    %7 = arith.truncf %4 : vector<32x24xf32> to vector<32x24xbf16>
    %cst = arith.constant dense<0.000000e+00> : vector<32x40xf32>
    %8 = tpu.matmul %6, %0, %cst {dimension_numbers = #tpu.dot_dimension_numbers<[1], [0], [0], [1], [0, 0, 1, 1], [], []>} : vector<32x40xbf16>, vector<40x40xbf16>, vector<32x40xf32> -> vector<32x40xf32>
    %9 = vector.extract_strided_slice %8 {offsets = [0, 0], sizes = [32, 16], strides = [1, 1]} : vector<32x40xf32> to vector<32x16xf32>
    %10 = arith.addf %2, %9 : vector<32x16xf32>
    %11 = vector.extract_strided_slice %8 {offsets = [0, 16], sizes = [32, 24], strides = [1, 1]} : vector<32x40xf32> to vector<32x24xf32>
    %12 = arith.addf %4, %11 : vector<32x24xf32>
    %13 = arith.truncf %8 : vector<32x40xf32> to vector<32x40xbf16>
    %cst_9 = arith.constant dense<0.000000e+00> : vector<32x40xf32>
    %14 = tpu.matmul %13, %0, %cst_9 {dimension_numbers = #tpu.dot_dimension_numbers<[1], [0], [0], [1], [0, 0, 1, 1], [], []>} : vector<32x40xbf16>, vector<40x40xbf16>, vector<32x40xf32> -> vector<32x40xf32>
    %15 = vector.extract_strided_slice %14 {offsets = [0, 0], sizes = [32, 16], strides = [1, 1]} : vector<32x40xf32> to vector<32x16xf32>
    %16 = arith.addf %10, %15 : vector<32x16xf32>
    %17 = vector.extract_strided_slice %14 {offsets = [0, 16], sizes = [32, 24], strides = [1, 1]} : vector<32x40xf32> to vector<32x24xf32>
    %18 = arith.addf %12, %17 : vector<32x24xf32>
    %cst_10 = arith.constant 0.333333343 : f32
    %19 = vector.broadcast %cst_10 : f32 to vector<32x16xf32>
    %20 = arith.mulf %16, %19 : vector<32x16xf32>
    %c0_11 = arith.constant 0 : index
    %c0_12 = arith.constant 0 : index
    %21 = vector.load %arg5[%c0_11, %c0_12] : memref<32x16xf32, #tpu.memory_space<vmem>>, vector<32x16xf32>
    tpu.vector_store %arg5[%c0_11, %c0_12], %20 {strides = array<i32>} : memref<32x16xf32, #tpu.memory_space<vmem>>, vector<32x16xf32>,
    %cst_13 = arith.constant 0.333333343 : f32
    %22 = vector.broadcast %cst_13 : f32 to vector<32x24xf32>
    %23 = arith.mulf %18, %22 : vector<32x24xf32>
    %24 = arith.truncf %3 : vector<32x8xf32> to vector<32x8xbf16>
    %25 = arith.truncf %23 : vector<32x24xf32> to vector<32x24xbf16>
    %26 = tpu.concatenate %24, %25 in 1 : vector<32x8xbf16>, vector<32x24xbf16> -> vector<32x32xbf16>
    %cst_14 = arith.constant dense<0.000000e+00> : vector<32x32xf32>
    %27 = tpu.matmul %26, %1, %cst_14 {dimension_numbers = #tpu.dot_dimension_numbers<[1], [0], [0], [1], [0, 0, 1, 1], [], []>} : vector<32x32xbf16>, vector<32x32xbf16>, vector<32x32xf32> -> vector<32x32xf32>
    %28 = vector.extract_strided_slice %27 {offsets = [0, 8], sizes = [32, 24], strides = [1, 1]} : vector<32x32xf32> to vector<32x24xf32>
    %29 = arith.addf %23, %28 : vector<32x24xf32>
    %30 = arith.truncf %27 : vector<32x32xf32> to vector<32x32xbf16>
    %cst_15 = arith.constant dense<0.000000e+00> : vector<32x32xf32>
    %31 = tpu.matmul %30, %1, %cst_15 {dimension_numbers = #tpu.dot_dimension_numbers<[1], [0], [0], [1], [0, 0, 1, 1], [], []>} : vector<32x32xbf16>, vector<32x32xbf16>, vector<32x32xf32> -> vector<32x32xf32>
    %32 = vector.extract_strided_slice %31 {offsets = [0, 8], sizes = [32, 24], strides = [1, 1]} : vector<32x32xf32> to vector<32x24xf32>
    %33 = arith.addf %29, %32 : vector<32x24xf32>
    %34 = vector.extract_strided_slice %31 {offsets = [0, 0], sizes = [32, 8], strides = [1, 1]} : vector<32x32xf32> to vector<32x8xf32>
    %35 = arith.addf %3, %34 : vector<32x8xf32>
    %cst_16 = arith.constant 0.333333343 : f32
    %36 = vector.broadcast %cst_16 : f32 to vector<32x24xf32>
    %37 = arith.mulf %33, %36 : vector<32x24xf32>
    %c0_17 = arith.constant 0 : index
    %c0_18 = arith.constant 0 : index
    %38 = vector.load %arg7[%c0_17, %c0_18] : memref<32x24xf32, #tpu.memory_space<vmem>>, vector<32x24xf32>
    tpu.vector_store %arg7[%c0_17, %c0_18], %37 {strides = array<i32>} : memref<32x24xf32, #tpu.memory_space<vmem>>, vector<32x24xf32>,
    %39 = vector.extract_strided_slice %1 {offsets = [0, 0], sizes = [8, 8], strides = [1, 1]} : vector<32x32xbf16> to vector<8x8xbf16>
    %40 = vector.extract_strided_slice %1 {offsets = [8, 0], sizes = [24, 8], strides = [1, 1]} : vector<32x32xbf16> to vector<24x8xbf16>
    %cst_19 = arith.constant dense<0.000000e+00> : vector<32x8xf32>
    %41 = tpu.matmul %24, %39, %cst_19 {dimension_numbers = #tpu.dot_dimension_numbers<[1], [0], [0], [1], [0, 0, 1, 1], [], []>} : vector<32x8xbf16>, vector<8x8xbf16>, vector<32x8xf32> -> vector<32x8xf32>
    %cst_20 = arith.constant 1.000000e+00 : f32
    %42 = vector.broadcast %cst_20 : f32 to vector<32x8xf32>
    %43 = arith.mulf %42, %41 : vector<32x8xf32>
    %44 = arith.addf %35, %43 : vector<32x8xf32>
    %cst_21 = arith.constant dense<0.000000e+00> : vector<32x8xf32>
    %45 = tpu.matmul %7, %40, %cst_21 {dimension_numbers = #tpu.dot_dimension_numbers<[1], [0], [0], [1], [0, 0, 1, 1], [], []>} : vector<32x24xbf16>, vector<24x8xbf16>, vector<32x8xf32> -> vector<32x8xf32>
    %46 = arith.addf %44, %45 : vector<32x8xf32>
    %cst_22 = arith.constant 0.333333343 : f32
    %47 = vector.broadcast %cst_22 : f32 to vector<32x8xf32>
    %48 = arith.mulf %46, %47 : vector<32x8xf32>
    %c0_23 = arith.constant 0 : index
    %c0_24 = arith.constant 0 : index
    %49 = vector.load %arg6[%c0_23, %c0_24] : memref<32x8xf32, #tpu.memory_space<vmem>>, vector<32x8xf32>
    tpu.vector_store %arg6[%c0_23, %c0_24], %48 {strides = array<i32>} : memref<32x8xf32, #tpu.memory_space<vmem>>, vector<32x8xf32>,
    return
  }
}

module attributes {stable_mosaic.version = 11 : i64} {
  func.func @kernel(%arg0: memref<16x16xbf16, #tpu.memory_space<vmem>>, %arg1: memref<32x16xf32, #tpu.memory_space<vmem>>, %arg2: memref<16x8xbf16, #tpu.memory_space<vmem>>, %arg3: memref<32x8xf32, #tpu.memory_space<vmem>>) attributes {dimension_semantics = [], scalar_prefetch = 0 : i64, scratch_operands = 0 : i64, tpu.core_type = #tpu.core_type<tc>} {
    %c0 = arith.constant 0 : index
    %c0_0 = arith.constant 0 : index
    %0 = vector.load %arg0[%c0, %c0_0] : memref<16x16xbf16, #tpu.memory_space<vmem>>, vector<16x16xbf16>
    %c0_1 = arith.constant 0 : index
    %c0_2 = arith.constant 0 : index
    %1 = vector.load %arg1[%c0_1, %c0_2] : memref<32x16xf32, #tpu.memory_space<vmem>>, vector<32x16xf32>
    %2 = arith.truncf %1 : vector<32x16xf32> to vector<32x16xbf16>
    %cst = arith.constant dense<0.000000e+00> : vector<32x16xf32>
    %3 = tpu.matmul %2, %0, %cst {dimension_numbers = #tpu.dot_dimension_numbers<[1], [0], [0], [1], [0, 0, 1, 1], [], []>} : vector<32x16xbf16>, vector<16x16xbf16>, vector<32x16xf32> -> vector<32x16xf32>
    %4 = arith.addf %1, %3 : vector<32x16xf32>
    %5 = arith.truncf %3 : vector<32x16xf32> to vector<32x16xbf16>
    %cst_3 = arith.constant dense<0.000000e+00> : vector<32x16xf32>
    %6 = tpu.matmul %5, %0, %cst_3 {dimension_numbers = #tpu.dot_dimension_numbers<[1], [0], [0], [1], [0, 0, 1, 1], [], []>} : vector<32x16xbf16>, vector<16x16xbf16>, vector<32x16xf32> -> vector<32x16xf32>
    %7 = arith.addf %4, %6 : vector<32x16xf32>
    %8 = arith.truncf %7 : vector<32x16xf32> to vector<32x16xbf16>
    %c0_4 = arith.constant 0 : index
    %c0_5 = arith.constant 0 : index
    %9 = vector.load %arg2[%c0_4, %c0_5] : memref<16x8xbf16, #tpu.memory_space<vmem>>, vector<16x8xbf16>
    %cst_6 = arith.constant dense<0.000000e+00> : vector<32x8xf32>
    %10 = tpu.matmul %8, %9, %cst_6 {dimension_numbers = #tpu.dot_dimension_numbers<[1], [0], [0], [1], [0, 0, 1, 1], [], []>} : vector<32x16xbf16>, vector<16x8xbf16>, vector<32x8xf32> -> vector<32x8xf32>
    %c0_7 = arith.constant 0 : index
    %c0_8 = arith.constant 0 : index
    %11 = vector.load %arg3[%c0_7, %c0_8] : memref<32x8xf32, #tpu.memory_space<vmem>>, vector<32x8xf32>
    tpu.vector_store %arg3[%c0_7, %c0_8], %10 {strides = array<i32>} : memref<32x8xf32, #tpu.memory_space<vmem>>, vector<32x8xf32>,
    return
  }
}

module attributes {stable_mosaic.version = 11 : i64} {
  func.func @_gate_combine_kernel(%arg0: memref<32x8xf32, #tpu.memory_space<vmem>>, %arg1: memref<32x8xf32, #tpu.memory_space<vmem>>, %arg2: memref<32x32xf32, #tpu.memory_space<vmem>>, %arg3: memref<32x1xf32, #tpu.memory_space<vmem>>, %arg4: memref<32x1xf32, #tpu.memory_space<vmem>>, %arg5: memref<1xf32, #tpu.memory_space<smem>>, %arg6: memref<32x8xf32, #tpu.memory_space<vmem>>) attributes {dimension_semantics = [], scalar_prefetch = 0 : i64, scratch_operands = 0 : i64, tpu.core_type = #tpu.core_type<tc>} {
    %c0 = arith.constant 0 : index
    %c0_0 = arith.constant 0 : index
    %0 = vector.load %arg0[%c0, %c0_0] : memref<32x8xf32, #tpu.memory_space<vmem>>, vector<32x8xf32>
    %c0_1 = arith.constant 0 : index
    %c0_2 = arith.constant 0 : index
    %1 = vector.load %arg1[%c0_1, %c0_2] : memref<32x8xf32, #tpu.memory_space<vmem>>, vector<32x8xf32>
    %2 = tpu.concatenate %0, %1 in 1 : vector<32x8xf32>, vector<32x8xf32> -> vector<32x16xf32>
    %c0_3 = arith.constant 0 : index
    %c0_4 = arith.constant 0 : index
    %3 = vector.load %arg2[%c0_3, %c0_4] : memref<32x32xf32, #tpu.memory_space<vmem>>, vector<32x32xf32>
    %cst = arith.constant dense<0.000000e+00> : vector<32x16xf32>
    %4 = tpu.matmul %3, %2, %cst {dimension_numbers = #tpu.dot_dimension_numbers<[1], [0], [0], [1], [0, 0, 1, 1], [], []>} : vector<32x32xf32>, vector<32x16xf32>, vector<32x16xf32> -> vector<32x16xf32>
    %c0_5 = arith.constant 0 : index
    %c0_6 = arith.constant 0 : index
    %5 = vector.load %arg3[%c0_5, %c0_6] : memref<32x1xf32, #tpu.memory_space<vmem>>, vector<32x1xf32>
    %6 = vector.broadcast %5 : vector<32x1xf32> to vector<32x16xf32>
    %7 = arith.addf %4, %6 : vector<32x16xf32>
    %cst_7 = arith.constant 0.000000e+00 : f32
    %8 = vector.broadcast %cst_7 : f32 to vector<32x16xf32>
    %9 = arith.maximumf %7, %8 : vector<32x16xf32>
    %c0_8 = arith.constant 0 : index
    %c0_9 = arith.constant 0 : index
    %10 = vector.load %arg4[%c0_8, %c0_9] : memref<32x1xf32, #tpu.memory_space<vmem>>, vector<32x1xf32>
    %11 = vector.broadcast %10 : vector<32x1xf32> to vector<32x16xf32>
    %12 = arith.mulf %9, %11 : vector<32x16xf32>
    %cst_10 = arith.constant dense<0.000000e+00> : vector<16xf32>
    %13 = vector.multi_reduction <add>, %12, %cst_10 [0] : vector<32x16xf32> to vector<16xf32>
    %14 = vector.shape_cast %13 : vector<16xf32> to vector<1x16xf32>
    %c0_11 = arith.constant 0 : index
    %15 = memref.load %arg5[%c0_11] : memref<1xf32, #tpu.memory_space<smem>>
    %16 = vector.broadcast %15 : f32 to vector<1x16xf32>
    %17 = arith.addf %14, %16 : vector<1x16xf32>
    %18 = arith.negf %17 : vector<1x16xf32>
    %19 = math.exp %18 : vector<1x16xf32>
    %cst_12 = arith.constant 1.000000e+00 : f32
    %20 = vector.broadcast %cst_12 : f32 to vector<1x16xf32>
    %21 = arith.addf %20, %19 : vector<1x16xf32>
    %22 = arith.divf %20, %21 : vector<1x16xf32>
    %23 = vector.extract_strided_slice %22 {offsets = [0, 0], sizes = [1, 8], strides = [1, 1]} : vector<1x16xf32> to vector<1x8xf32>
    %24 = vector.broadcast %23 : vector<1x8xf32> to vector<32x8xf32>
    %25 = arith.mulf %24, %0 : vector<32x8xf32>
    %26 = vector.extract_strided_slice %22 {offsets = [0, 8], sizes = [1, 8], strides = [1, 1]} : vector<1x16xf32> to vector<1x8xf32>
    %27 = vector.broadcast %26 : vector<1x8xf32> to vector<32x8xf32>
    %28 = arith.mulf %27, %1 : vector<32x8xf32>
    %29 = arith.addf %25, %28 : vector<32x8xf32>
    %c0_13 = arith.constant 0 : index
    %c0_14 = arith.constant 0 : index
    %30 = vector.load %arg6[%c0_13, %c0_14] : memref<32x8xf32, #tpu.memory_space<vmem>>, vector<32x8xf32>
    tpu.vector_store %arg6[%c0_13, %c0_14], %29 {strides = array<i32>} : memref<32x8xf32, #tpu.memory_space<vmem>>, vector<32x8xf32>,
    return
  }
}

module attributes {stable_mosaic.version = 11 : i64} {
  func.func @kernel(%arg0: memref<24x24xbf16, #tpu.memory_space<vmem>>, %arg1: memref<32x24xf32, #tpu.memory_space<vmem>>, %arg2: memref<32x24xf32, #tpu.memory_space<vmem>>) attributes {dimension_semantics = [], scalar_prefetch = 0 : i64, scratch_operands = 0 : i64, tpu.core_type = #tpu.core_type<tc>} {
    %c0 = arith.constant 0 : index
    %c0_0 = arith.constant 0 : index
    %0 = vector.load %arg0[%c0, %c0_0] : memref<24x24xbf16, #tpu.memory_space<vmem>>, vector<24x24xbf16>
    %c0_1 = arith.constant 0 : index
    %c0_2 = arith.constant 0 : index
    %1 = vector.load %arg1[%c0_1, %c0_2] : memref<32x24xf32, #tpu.memory_space<vmem>>, vector<32x24xf32>
    %2 = arith.truncf %1 : vector<32x24xf32> to vector<32x24xbf16>
    %cst = arith.constant dense<0.000000e+00> : vector<32x24xf32>
    %3 = tpu.matmul %2, %0, %cst {dimension_numbers = #tpu.dot_dimension_numbers<[1], [0], [0], [1], [0, 0, 1, 1], [], []>} : vector<32x24xbf16>, vector<24x24xbf16>, vector<32x24xf32> -> vector<32x24xf32>
    %4 = arith.addf %1, %3 : vector<32x24xf32>
    %5 = arith.truncf %3 : vector<32x24xf32> to vector<32x24xbf16>
    %cst_3 = arith.constant dense<0.000000e+00> : vector<32x24xf32>
    %6 = tpu.matmul %5, %0, %cst_3 {dimension_numbers = #tpu.dot_dimension_numbers<[1], [0], [0], [1], [0, 0, 1, 1], [], []>} : vector<32x24xbf16>, vector<24x24xbf16>, vector<32x24xf32> -> vector<32x24xf32>
    %7 = arith.addf %4, %6 : vector<32x24xf32>
    %c0_4 = arith.constant 0 : index
    %c0_5 = arith.constant 0 : index
    %8 = vector.load %arg2[%c0_4, %c0_5] : memref<32x24xf32, #tpu.memory_space<vmem>>, vector<32x24xf32>
    tpu.vector_store %arg2[%c0_4, %c0_5], %7 {strides = array<i32>} : memref<32x24xf32, #tpu.memory_space<vmem>>, vector<32x24xf32>,
    return
  }
}

module attributes {stable_mosaic.version = 11 : i64} {
  func.func @_predict_kernel(%arg0: memref<4x32xf32, #tpu.memory_space<vmem>>, %arg1: memref<4x32xf32, #tpu.memory_space<vmem>>, %arg2: memref<32x8xf32, #tpu.memory_space<vmem>>, %arg3: memref<1x8xf32, #tpu.memory_space<vmem>>, %arg4: memref<1x8xf32, #tpu.memory_space<vmem>>, %arg5: memref<1xf32, #tpu.memory_space<smem>>, %arg6: memref<4x1xf32, #tpu.memory_space<vmem>>) attributes {dimension_semantics = [], scalar_prefetch = 0 : i64, scratch_operands = 0 : i64, tpu.core_type = #tpu.core_type<tc>} {
    %c0 = arith.constant 0 : index
    %c0_0 = arith.constant 0 : index
    %0 = vector.load %arg0[%c0, %c0_0] : memref<4x32xf32, #tpu.memory_space<vmem>>, vector<4x32xf32>
    %c0_1 = arith.constant 0 : index
    %c0_2 = arith.constant 0 : index
    %1 = vector.load %arg1[%c0_1, %c0_2] : memref<4x32xf32, #tpu.memory_space<vmem>>, vector<4x32xf32>
    %2 = arith.mulf %0, %1 : vector<4x32xf32>
    %c0_3 = arith.constant 0 : index
    %c0_4 = arith.constant 0 : index
    %3 = vector.load %arg2[%c0_3, %c0_4] : memref<32x8xf32, #tpu.memory_space<vmem>>, vector<32x8xf32>
    %cst = arith.constant dense<0.000000e+00> : vector<4x8xf32>
    %4 = tpu.matmul %2, %3, %cst {dimension_numbers = #tpu.dot_dimension_numbers<[1], [0], [0], [1], [0, 0, 1, 1], [], []>} : vector<4x32xf32>, vector<32x8xf32>, vector<4x8xf32> -> vector<4x8xf32>
    %c0_5 = arith.constant 0 : index
    %c0_6 = arith.constant 0 : index
    %5 = vector.load %arg3[%c0_5, %c0_6] : memref<1x8xf32, #tpu.memory_space<vmem>>, vector<1x8xf32>
    %6 = vector.broadcast %5 : vector<1x8xf32> to vector<4x8xf32>
    %7 = arith.addf %4, %6 : vector<4x8xf32>
    %cst_7 = arith.constant 0.000000e+00 : f32
    %8 = vector.broadcast %cst_7 : f32 to vector<4x8xf32>
    %9 = arith.maximumf %7, %8 : vector<4x8xf32>
    %c0_8 = arith.constant 0 : index
    %c0_9 = arith.constant 0 : index
    %10 = vector.load %arg4[%c0_8, %c0_9] : memref<1x8xf32, #tpu.memory_space<vmem>>, vector<1x8xf32>
    %11 = vector.broadcast %10 : vector<1x8xf32> to vector<4x8xf32>
    %12 = arith.mulf %9, %11 : vector<4x8xf32>
    %cst_10 = arith.constant dense<0.000000e+00> : vector<4xf32>
    %13 = vector.multi_reduction <add>, %12, %cst_10 [1] : vector<4x8xf32> to vector<4xf32>
    %14 = vector.shape_cast %13 : vector<4xf32> to vector<4x1xf32>
    %c0_11 = arith.constant 0 : index
    %15 = memref.load %arg5[%c0_11] : memref<1xf32, #tpu.memory_space<smem>>
    %16 = vector.broadcast %15 : f32 to vector<4x1xf32>
    %17 = arith.addf %14, %16 : vector<4x1xf32>
    %18 = arith.negf %17 : vector<4x1xf32>
    %19 = math.exp %18 : vector<4x1xf32>
    %cst_12 = arith.constant 1.000000e+00 : f32
    %20 = vector.broadcast %cst_12 : f32 to vector<4x1xf32>
    %21 = arith.addf %20, %19 : vector<4x1xf32>
    %22 = arith.divf %20, %21 : vector<4x1xf32>
    %c0_13 = arith.constant 0 : index
    %c0_14 = arith.constant 0 : index
    %23 = vector.load %arg6[%c0_13, %c0_14] : memref<4x1xf32, #tpu.memory_space<vmem>>, vector<4x1xf32>
    tpu.vector_store %arg6[%c0_13, %c0_14], %22 {strides = array<i32>} : memref<4x1xf32, #tpu.memory_space<vmem>>, vector<4x1xf32>,
    return
  }
}

</mosaic_0001>

<bundles_post_ra>
// kernel: hrdprec_forward.6
= control target key start
LH: loop header
LB: loop body
LE: loop exit
PB: predicated region body
PF: predicated region fallthrough
CT: control target
= control target key end

     0   :  { %vm29_vm0 = vcmask 130048   ;;  %vm215_vm1 = vcmask 64512   ;;  %s317_s0 = inlined_call_operand.vmem [shape: bf16[16,16], index: 0, kind: input, shape index: {}]   ;;  %s318_s1 = inlined_call_operand.vmem [shape: f32[32,16], index: 1, kind: input, shape index: {}]   ;;  %s319_s2 = inlined_call_operand.vmem [shape: bf16[16,8], index: 2, kind: input, shape index: {}]   ;;  %s320_s3 = inlined_call_operand.vmem [shape: f32[32,8], index: 3, kind: output, shape index: {}]  }
   0x1   :  { %v259_v0 = vld [vmem:[%s317_s0] sm:$0xff]   ;;  %v18_v2 = vld [vmem:[%s318_s1 + $0x8] sm:$0xff]  ;;  %v19_v3 = vld [vmem:[%s318_s1 + $0x10] sm:$0xff] }
   0x2   :  { %v17_v1 = vld [vmem:[%s318_s1] sm:$0xff]  ;;  %241 = vmatprep.subr.bf16.mxu0 %v259_v0  ;;  %v20_v5 = vld [vmem:[%s318_s1 + $0x18] sm:$0xff]  ;;  %247 = vmatprep.subr.bf16.mxu1 %v259_v0 }
   0x3   :  { %v21_v4 = vpack.c.bf16 %v18_v2, %v17_v1  ;;  %242 = vmatpush3.bf16.msra.mxu0 %v259_v0  ;;  %v22_v6 = vpack.c.bf16 %v20_v5, %v19_v3  ;;  %248 = vmatpush3.bf16.msra.mxu1 %v259_v0  ;;  %v260_v13 = vld [vmem:[%s319_s2] sm:$0xff]  }
   0x4   :  { %253 = vmatprep.subr.bf16.mxu0 %v260_v13 }
   0x5   :  { %243 = vmatprep.mubr.msk.bf16.mxu0 %vm29_vm0, %v21_v4 }
   0x6   :  { %244 = vmatmul.mubr.msk.bf16.vlgmr.msra.gmra.mrb[0].mxu0 %vm29_vm0, %v22_v6 }
   0x7   :  { %254 = vmatpush3.bf16.msra.mxu0 %v260_v13 }
  0xd9   :  { %v245_v7 = vpop.f32.mrb[0].mxu0 }
  0xda   :  { %v70_v8 = vpop.f32.mrb[1].mxu0  ;;  %v87_v14 = vadd.f32 %v245_v7, %v19_v3 }
  0xdb   :  { %v246_v9 = vpop.f32.mrb[2].mxu0  ;;  %v85_v15 = vadd.f32 %v70_v8, %v17_v1 }
  0xdc   :  { %v90_v10 = vpack.c.bf16 %v246_v9, %v245_v7  ;;  %v73_v11 = vpop.f32.mrb[3].mxu0  ;;  %v88_v17 = vadd.f32 %v246_v9, %v20_v5 }
  0xdd   :  { %v89_v12 = vpack.c.bf16 %v73_v11, %v70_v8  ;;  %v86_v20 = vadd.f32 %v73_v11, %v18_v2 }
  0xdf   :  { %249 = vmatprep.mubr.msk.bf16.mxu1 %vm29_vm0, %v89_v12 }
  0xe0   :  { %250 = vmatmul.mubr.msk.bf16.vlgmr.msra.gmra.mrb[0].mxu1 %vm29_vm0, %v90_v10 }
 0x1b3   :  { %v251_v16 = vpop.f32.mrb[0].mxu1 }
 0x1b4   :  { %v148_v18 = vadd.f32 %v251_v16, %v87_v14  ;;  %v131_v19 = vpop.f32.mrb[1].mxu1 }
 0x1b5   :  { %v146_v21 = vadd.f32 %v131_v19, %v85_v15  ;;  %v252_v22 = vpop.f32.mrb[2].mxu1 }
 0x1b6   :  { %v149_v23 = vadd.f32 %v252_v22, %v88_v17  ;;  %v134_v24 = vpop.f32.mrb[3].mxu1 }
 0x1b7   :  { %v147_v25 = vadd.f32 %v134_v24, %v86_v20 }
 0x1b8   :  { %v151_v26 = vpack.c.bf16 %v149_v23, %v148_v18 }
 0x1b9   :  { %v150_v27 = vpack.c.bf16 %v147_v25, %v146_v21 }
 0x1bb   :  { %255 = vmatprep.mubr.msk.bf16.mxu0 %vm29_vm0, %v150_v27 }
 0x1bc   :  { %256 = vmatmul.mubr.msk.bf16.vlgmr.msra.gmra.mrb[4].mxu0 %vm29_vm0, %v151_v26 }
 0x28f   :  { %v257_v28 = vpop.f32.mrb[4].mxu0 }
 0x290   :  { %218 = vst.msk [vmem:[%s320_s3 + $0x10] sm:$0xff] %vm215_vm1, %v257_v28  ;;  %v200_v29 = vpop.f32.mrb[5].mxu0 }
 0x291   :  { %216 = vst.msk [vmem:[%s320_s3] sm:$0xff] %vm215_vm1, %v200_v29  ;;  %v258_v30 = vpop.f32.mrb[6].mxu0 }
 0x292   :  { %219 = vst.msk [vmem:[%s320_s3 + $0x18] sm:$0xff] %vm215_vm1, %v258_v30  ;;  %v203_v31 = vpop.f32.mrb[7].mxu0 }
 0x293   :  { %217 = vst.msk [vmem:[%s320_s3 + $0x8] sm:$0xff] %vm215_vm1, %v203_v31 }

// kernel: hrdprec_forward.8
= control target key start
LH: loop header
LB: loop body
LE: loop exit
PB: predicated region body
PF: predicated region fallthrough
CT: control target
= control target key end

     0   :  { %s318_s25 = smov 8   ;;  %vm81_vm0 = vcmask 261120   ;;  %v319_v6 = vmov 0   ;;  %vm48_vm1 = vcmask 64512   ;;  %vm211_vm2 = vcmask 130048   ;;  %s320_s11 = smov 120   ;;  %s475_s1 = inlined_call_operand.vmem [shape: f32[32,8], index: 1, kind: input, shape index: {}]   ;;  %s476_s2 = inlined_call_operand.vmem [shape: f32[32,32], index: 2, kind: input, shape index: {}]   ;;  %s477_s3 = inlined_call_operand.vmem [shape: f32[32,1], index: 3, kind: input, shape index: {}]   ;;  %s478_s4 = inlined_call_operand.vmem [shape: f32[32,1], index: 4, kind: input, shape index: {}]   ;;  %s479_s0 = inlined_call_operand.vmem [shape: f32[32,8], index: 0, kind: input, shape index: {}]   ;;  %s480_s5 = inlined_call_operand.<no memory space> [shape: f32[1], index: 5, kind: input, shape index: {}]   ;;  %s481_s6 = inlined_call_operand.vmem [shape: f32[32,8], index: 6, kind: output, shape index: {}]  }
   0x1   :  { %v30_v0 = vld [vmem:[%s475_s1 + $0x10] sm:$0xff]  ;;  %v28_v1 = vld [vmem:[%s475_s1] sm:$0xff]  ;;  %v31_v2 = vld [vmem:[%s475_s1 + $0x18] sm:$0xff]  ;;  %313 = vset.pattern.permute.xlu1 %v319_v6  ;;  %312 = vset.pattern.permute.xlu0 %v319_v6 }
   0x2   :  { %40 = vrot.lane.b32.xlu1 %v30_v0, %s318_s25  ;;  %36 = vrot.lane.b32.xlu0 %v28_v1, %s318_s25  ;;  %v29_v3 = vld [vmem:[%s475_s1 + $0x8] sm:$0xff]  ;;  %v53_v4 = vld [vmem:[%s476_s2] sm:$0xff] }
   0x3   :  { %v55_v5 = vld [vmem:[%s476_s2 + $0x10] sm:$0xff]  ;;  %291 = vmatprep.mubr.msk.f32.mxu0 %vm81_vm0, %v53_v4  ;;  %v58_v7 = vld [vmem:[%s477_s3 + $0x8] sm:$0xff]  ;;  %v57_v8 = vld [vmem:[%s477_s3] sm:$0xff] }
   0x4   :  { %294 = vmatprep.mubr.msk.f32.mxu1 %vm81_vm0, %v55_v5  ;;  %v59_v9 = vld [vmem:[%s477_s3 + $0x10] sm:$0xff]  ;;  %v60_v10 = vld [vmem:[%s477_s3 + $0x18] sm:$0xff]  ;;  %v183_v11 = vld [vmem:[%s478_s4] sm:$0xff] }
   0x5   :  { %v184_v12 = vld [vmem:[%s478_s4 + $0x8] sm:$0xff]  ;;  %v185_v13 = vld [vmem:[%s478_s4 + $0x10] sm:$0xff]  ;;  %v186_v14 = vld [vmem:[%s478_s4 + $0x18] sm:$0xff] }
   0x6   :  { %42 = vrot.lane.b32.xlu1 %v31_v2, %s318_s25  ;;  %38 = vrot.lane.b32.xlu0 %v29_v3, %s318_s25  ;;  %v407_v17 = vld [vmem:[%s479_s0 + $0x10] sm:$0xff]  ;;  %v412_v18 = vld [vmem:[%s479_s0] sm:$0xff] }
   0x7   :  { %v417_v19 = vld [vmem:[%s479_s0 + $0x18] sm:$0xff]  ;;  %v422_v20 = vld [vmem:[%s479_s0 + $0x8] sm:$0xff]  ;;  %v226_v3 = vstv %s480_s5 }
   0x8   :  { %v54_v29 = vld [vmem:[%s476_s2 + $0x8] sm:$0xff]  ;;  %v56_v30 = vld [vmem:[%s476_s2 + $0x18] sm:$0xff] }
   0xa   :  { %68 = vperm.xlu1 %313, %v58_v7   ;;  %63 = vperm.xlu0 %312, %v57_v8  }
   0xe   :  { %73 = vperm.xlu1 %313, %v59_v9   ;;  %78 = vperm.xlu0 %312, %v60_v10  }
  0x12   :  { %189 = vperm.xlu1 %313, %v183_v11   ;;  %194 = vperm.xlu0 %312, %v184_v12  }
  0x16   :  { %199 = vperm.xlu1 %313, %v185_v13   ;;  %204 = vperm.xlu0 %312, %v186_v14  }
  0x74   :  { %v400_v15 = vpop.permute.xlu1 %40  ;;  %v402_v16 = vpop.permute.xlu0 %36 }
  0x75   :  { %v51_v23 = vsel %vm48_vm1, %v407_v17, %v400_v15  ;;  %v49_v24 = vsel %vm48_vm1, %v412_v18, %v402_v16 }
  0x78   :  { %v424_v21 = vpop.permute.xlu1 %42  ;;  %v426_v22 = vpop.permute.xlu0 %38 }
  0x79   :  { %v52_v25 = vsel %vm48_vm1, %v417_v19, %v424_v21  ;;  %v50_v26 = vsel %vm48_vm1, %v422_v20, %v426_v22 }
  0x7a   :  { %v297_v27 = vpack.c.bf16 %v50_v26, %v49_v24  ;;  %v301_v28 = vpack.c.bf16 %v52_v25, %v51_v23 }
  0x7c   :  { %298 = vmatprep.subr.bf16.mxu0 %v297_v27  ;;  %305 = vmatprep.subr.bf16.mxu1 %v297_v27 }
  0x7d   :  { %300 = vmatpush3.bf16.msra.mxu0 %v297_v27  ;;  %307 = vmatpush3.bf16.msra.mxu1 %v297_v27 }
  0x7e   :  { %302 = vmatprep.subr.bf16.mxu0 %v301_v28  ;;  %306 = vmatprep.subr.bf16.mxu1 %v301_v28 }
  0x81   :  { %304 = vmatpush3.bf16.msra.mxu0 %v301_v28  ;;  %308 = vmatpush3.bf16.msra.mxu1 %v301_v28 }
  0x84   :  { %292 = vmatmul.mubr.msk.f32.vlgmr.msra.gmra.mrb[0].mxu0 %vm81_vm0, %v54_v29  ;;  %295 = vmatmul.mubr.msk.f32.vlgmr.msra.gmra.mrb[0].mxu1 %vm81_vm0, %v56_v30 }
  0x89   :  { %v69_v31 = vpop.permute.xlu1 %68  ;;  %v64_v32 = vpop.permute.xlu0 %63 }
  0x8d   :  { %v74_v33 = vpop.permute.xlu1 %73  ;;  %v79_v34 = vpop.permute.xlu0 %78 }
  0x91   :  { %v190_v35 = vpop.permute.xlu1 %189  ;;  %v195_v36 = vpop.permute.xlu0 %194 }
  0x95   :  { %v200_v49 = vpop.permute.xlu1 %199  ;;  %v205_v53 = vpop.permute.xlu0 %204 }
 0x157   :  { %v293_v37 = vpop.f32.mrb[0].mxu0  ;;  %v296_v38 = vpop.f32.mrb[0].mxu1 }
 0x158   :  { %v166_v39 = vadd.f32 %v293_v37, %v69_v31  ;;  %v176_v40 = vadd.f32 %v296_v38, %v79_v34  ;;  %v160_v41 = vpop.f32.mrb[1].mxu0  ;;  %v170_v42 = vpop.f32.mrb[1].mxu1 }
 0x159   :  { %v161_v43 = vadd.f32 %v160_v41, %v64_v32  ;;  %v171_v44 = vadd.f32 %v170_v42, %v74_v33 }
 0x15a   :  { %v180_v45 = vmax.f32 %v166_v39, 0.0  ;;  %v182_v46 = vmax.f32 %v176_v40, 0.0 }
 0x15b   :  { %v179_v47 = vmax.f32 %v161_v43, 0.0  ;;  %v181_v48 = vmax.f32 %v171_v44, 0.0 }
 0x15c   :  { %v208_v50 = vmul.f32 %v195_v36, %v180_v45  ;;  %v210_v55 = vmul.f32 %v205_v53, %v182_v46 }
 0x15d   :  { %v207_v51 = vmul.f32 %v190_v35, %v179_v47  ;;  %v209_v52 = vmul.f32 %v200_v49, %v181_v48 }
 0x15e   :  { %v213_v54 = vsel %vm211_vm2, %v208_v50, 0.0  ;;  %v217_v60 = vsel %vm211_vm2, %v210_v55, 0.0 }
 0x15f   :  { %v212_v56 = vsel %vm211_vm2, %v207_v51, 0.0  ;;  %v215_v58 = vsel %vm211_vm2, %v209_v52, 0.0 }
 0x160   :  { %v214_v57 = vadd.f32 %v213_v54, %v212_v56 }
 0x162   :  { %v216_v59 = vadd.f32 %v215_v58, %v214_v57 }
 0x164   :  { %v218_v61 = vadd.f32 %v217_v60, %v216_v59 }
 0x166   :  { %v219_v62 = vrot.slane %v218_v61, 4 }
 0x168   :  { %v220_v63 = vadd.f32 %v219_v62, %v218_v61 }
 0x16a   :  { %v221_v0 = vrot.slane %v220_v63, 2 }
 0x16c   :  { %v222_v1 = vadd.f32 %v221_v0, %v220_v63 }
 0x16e   :  { %v223_v2 = vrot.slane %v222_v1, 1 }
 0x170   :  { %v224_v4 = vadd.f32 %v223_v2, %v222_v1 }
 0x172   :  { %v227_v5 = vadd.f32 %v226_v3, %v224_v4 }
 0x174   :  { %v274_v6 = vmul.f32 -1.442695, %v227_v5 }
 0x176   :  { %314 = vpow2.f32 %v274_v6 }
 0x180   :  { %v315_v7 = vpop.eup %314 }
 0x181   :  { %v231_v8 = vadd.f32 1.0, %v315_v7 }
 0x183   :  { %316 = vrcp.f32 %v231_v8 }
 0x18d   :  { %v317_v9 = vpop.eup %316 }
 0x18e   :  { %v239_v10 = vmul.f32 %v317_v9, %v426_v22  ;;  %v238_v11 = vmul.f32 %v317_v9, %v402_v16  ;;  %v241_v12 = vmul.f32 %v317_v9, %v424_v21  ;;  %v240_v13 = vmul.f32 %v317_v9, %v400_v15 }
 0x18f   :  { %v235_v14 = vmul.f32 %v317_v9, %v422_v20  ;;  %v234_v23 = vmul.f32 %v317_v9, %v412_v18  ;;  %v237_v15 = vmul.f32 %v317_v9, %v417_v19  ;;  %v236_v16 = vmul.f32 %v317_v9, %v407_v17 }
 0x190   :  { %248 = vrot.lane.b32.xlu0 %v239_v10, %s320_s11  ;;  %246 = vrot.lane.b32.xlu1 %v238_v11, %s320_s11 }
 0x194   :  { %252 = vrot.lane.b32.xlu0 %v241_v12, %s320_s11  ;;  %250 = vrot.lane.b32.xlu1 %v240_v13, %s320_s11 }
 0x202   :  { %v249_v24 = vpop.permute.xlu0 %248  ;;  %v247_v25 = vpop.permute.xlu1 %246 }
 0x203   :  { %v259_v26 = vadd.f32 %v249_v24, %v235_v14  ;;  %v258_v27 = vadd.f32 %v247_v25, %v234_v23 }
 0x205   :  { %263 = vst.msk [vmem:[%s481_s6 + $0x8] sm:$0xff] %vm48_vm1, %v259_v26  ;;  %262 = vst.msk [vmem:[%s481_s6] sm:$0xff] %vm48_vm1, %v258_v27 }
 0x206   :  { %v253_v20 = vpop.permute.xlu0 %252  ;;  %v251_v18 = vpop.permute.xlu1 %250 }
 0x207   :  { %v261_v21 = vadd.f32 %v253_v20, %v237_v15  ;;  %v260_v22 = vadd.f32 %v251_v18, %v236_v16 }
 0x209   :  { %265 = vst.msk [vmem:[%s481_s6 + $0x18] sm:$0xff] %vm48_vm1, %v261_v21  ;;  %264 = vst.msk [vmem:[%s481_s6 + $0x10] sm:$0xff] %vm48_vm1, %v260_v22 }

// kernel: hrdprec_forward.5
= control target key start
LH: loop header
LB: loop body
LE: loop exit
PB: predicated region body
PF: predicated region fallthrough
CT: control target
= control target key end

     0   :  { %s727_s11 = smov 16   ;;  %vm92_vm0 = vcmask 1043456   ;;  %vm61_vm1 = vcmask 130048   ;;  %vm85_vm2 = vcmask 326656   ;;  %s728_s22 = smov 112   ;;  %vm272_vm3 = vcmask 64512   ;;  %s979_s4 = inlined_call_operand.vmem [shape: f32[32,24], index: 4, kind: input, shape index: {}]   ;;  %s980_s0 = inlined_call_operand.vmem [shape: bf16[40,40], index: 0, kind: input, shape index: {}]   ;;  %s981_s2 = inlined_call_operand.vmem [shape: f32[32,16], index: 2, kind: input, shape index: {}]   ;;  %s982_s1 = inlined_call_operand.vmem [shape: bf16[32,32], index: 1, kind: input, shape index: {}]   ;;  %s983_s3 = inlined_call_operand.vmem [shape: f32[32,8], index: 3, kind: input, shape index: {}]   ;;  %s984_s5 = inlined_call_operand.vmem [shape: f32[32,16], index: 5, kind: output, shape index: {0}]   ;;  %s985_s6 = inlined_call_operand.vmem [shape: f32[32,8], index: 6, kind: output, shape index: {1}]   ;;  %s986_s7 = inlined_call_operand.vmem [shape: f32[32,24], index: 7, kind: output, shape index: {2}]  }
   0x1   :  { %v774_v0 = vld [vmem:[%s979_s4] sm:$0xff]  ;;  %v779_v1 = vld [vmem:[%s979_s4 + $0x8] sm:$0xff]  ;;  %v784_v2 = vld [vmem:[%s979_s4 + $0x10] sm:$0xff]  ;;  %vm291_vm4 = vcmask 261120   ;;  %vm450_vm5 = vcmask 195584  }
   0x2   :  { %v710_v3 = vpack.i.bf16 %v779_v1, %v774_v0  ;;  %v791_v4 = vld [vmem:[%s979_s4 + $0x18] sm:$0xff]  ;;  %v720_v5 = vld [vmem:[%s980_s0] sm:$0xff]   ;;  %v721_v7 = vld [vmem:[%s980_s0 + $0x8] sm:$0xff]  }
   0x3   :  { %v715_v6 = vpack.i.bf16 %v791_v4, %v784_v2  ;;  %644 = vmatprep.subr.bf16.mxu0 %v720_v5  ;;  %654 = vmatprep.subr.bf16.mxu1 %v720_v5  ;;  %v722_v8 = vld [vmem:[%s980_s0 + $0x10] ss:$0 sps:$4 sm:$0xff]   ;;  %v33_v11 = vld [vmem:[%s981_s2] sm:$0xff]  ;;  %v34_v12 = vld [vmem:[%s981_s2 + $0x8] sm:$0xff] }
   0x4   :  { %711 = vrot.lane.b32.xlu0 %v710_v3, %s727_s11  ;;  %645 = vmatpush3.bf16.msra.mxu0 %v720_v5  ;;  %v94_v9 = vsel %vm92_vm0, %v722_v8, 0  ;;  %v35_v18 = vld [vmem:[%s981_s2 + $0x10] sm:$0xff]  ;;  %v36_v19 = vld [vmem:[%s981_s2 + $0x18] sm:$0xff]  ;;  %v29_v41 = vld [vmem:[%s982_s1] sm:$0xf] }
   0x5   :  { %655 = vmatpush3.bf16.msra.mxu1 %v720_v5  ;;  %646 = vmatprep.subr.bf16.mxu0 %v721_v7  ;;  %v838_v42 = vld [vmem:[%s982_s1 + $0x4] sm:$0xf]  ;;  %v851_v48 = vld [vmem:[%s983_s3 + $0x8] sm:$0xff]  ;;  %v889_v63 = vld [vmem:[%s983_s3 + $0x10] sm:$0xff] }
   0x6   :  { %656 = vmatprep.subr.bf16.mxu1 %v721_v7  ;;  %v843_v43 = vld [vmem:[%s983_s3] sm:$0xff]  ;;  %v846_v47 = vcombine.low %v29_v41, %v838_v42  ;;  %v31_v56 = vld [vmem:[%s982_s1 + $0x8] sm:$0xf]  ;;  %v32_v57 = vld [vmem:[%s982_s1 + $0xc] sm:$0xf]  ;;  %s729_s1 = smov 8  }
   0x7   :  { %v262_v52 = vpack.c.bf16 %v851_v48, %v843_v43  ;;  %v608_v58 = vcombine.low %v31_v56, %v32_v57  ;;  %v894_v3 = vld [vmem:[%s983_s3 + $0x18] sm:$0xff]  ;;  %s730_s3 = smov 120  }
   0x8   :  { %716 = vrot.lane.b32.xlu0 %v715_v6, %s727_s11  ;;  %647 = vmatpush3.bf16.msra.mxu0 %v721_v7 }
   0x9   :  { %657 = vmatpush3.bf16.msra.mxu1 %v721_v7  ;;  %702 = vmatprep.subr.msk.bf16.mxu0 %vm92_vm0, %v722_v8  ;;  %v460_v7 = vsel %vm92_vm0, %v29_v41, 0 }
   0xa   :  { %703 = vmatprep.subr.msk.bf16.mxu1 %vm92_vm0, %v722_v8 }
   0xc   :  { %649 = vmatpush3.bf16.msra.mxu0 %v94_v9 }
   0xd   :  { %659 = vmatpush3.bf16.msra.mxu1 %v94_v9  ;;  %704 = vmatprep.subr.msk.bf16.mxu0 %vm92_vm0, %v29_v41 }
   0xe   :  { %664 = vmatprep.subr.bf16.mxu1 %v846_v47 }
  0x76   :  { %v712_v10 = vpop.permute.xlu0 %711 }
  0x77   :  { %v714_v13 = vunpack.i.h.bf16 %v712_v10  ;;  %v713_v14 = vunpack.i.l.bf16 %v712_v10 }
  0x79   :  { %v62_v15 = vsel %vm61_vm1, %v33_v11, %v713_v14  ;;  %v63_v16 = vsel %vm61_vm1, %v34_v12, %v714_v13 }
  0x7a   :  { %v717_v17 = vpop.permute.xlu0 %716  ;;  %v66_v20 = vpack.c.bf16 %v63_v16, %v62_v15 }
  0x7b   :  { %v719_v21 = vunpack.i.h.bf16 %v717_v17  ;;  %v718_v22 = vunpack.i.l.bf16 %v717_v17 }
  0x7c   :  { %650 = vmatprep.mubr.msk.bf16.mxu0 %vm85_vm2, %v66_v20 }
  0x7d   :  { %v64_v23 = vsel %vm61_vm1, %v35_v18, %v718_v22  ;;  %v65_v24 = vsel %vm61_vm1, %v36_v19, %v719_v21 }
  0x7e   :  { %v67_v25 = vpack.c.bf16 %v65_v24, %v64_v23 }
  0x80   :  { %651 = vmatmul.mubr.msk.bf16.vlgmr.msra.gmra.mrb[0].mxu0 %vm85_vm2, %v67_v25 }
  0x81   :  { %682 = vmatprep.mubr.msk.bf16.mxu0 %vm272_vm3, %v262_v52  ;;  %681 = vmatpush3.bf16.msra.mxu0 %v460_v7 }
 0x153   :  { %v652_v26 = vpop.f32.mrb[0].mxu0 }
 0x154   :  { %157 = vrot.lane.b32.xlu0 %v652_v26, %s728_s22  ;;  %v130_v27 = vpop.f32.mrb[1].mxu0  ;;  %v147_v32 = vadd.f32 %v652_v26, %v35_v18 }
 0x155   :  { %153 = vrot.lane.b32.xlu1 %v130_v27, %s728_s22  ;;  %v653_v28 = vpop.f32.mrb[2].mxu0  ;;  %v145_v33 = vadd.f32 %v130_v27, %v33_v11  ;;  %v263_v11 = vpack.c.bf16 %v894_v3, %v889_v63 }
 0x156   :  { %v170_v29 = vpack.c.bf16 %v653_v28, %v652_v26  ;;  %v133_v30 = vpop.f32.mrb[3].mxu0  ;;  %v148_v35 = vadd.f32 %v653_v28, %v36_v19 }
 0x157   :  { %v169_v31 = vpack.c.bf16 %v133_v30, %v130_v27  ;;  %v146_v38 = vadd.f32 %v133_v30, %v34_v12  ;;  %683 = vmatmul.mubr.msk.bf16.vlgmr.msra.gmra.mrb[4].mxu0 %vm272_vm3, %v263_v11  ;;  %v615_v27 = vcombine.low %v838_v42, %v31_v56 }
 0x159   :  { %159 = vrot.lane.b32.xlu1 %v653_v28, %s728_s22  ;;  %660 = vmatprep.mubr.msk.bf16.mxu1 %vm85_vm2, %v169_v31  ;;  %v616_v28 = vcombine.low %v32_v57, %v32_v57 }
 0x15a   :  { %661 = vmatmul.mubr.msk.bf16.vlgmr.msra.gmra.mrb[0].mxu1 %vm85_vm2, %v170_v29  ;;  %686 = vmatprep.subr.bf16.mxu0 %v615_v27  ;;  %v68_v29 = vpack.c.bf16 %v779_v1, %v774_v0 }
 0x15b   :  { %665 = vmatpush3.bf16.msra.mxu1 %v846_v47  ;;  %687 = vmatpush3.bf16.msra.mxu0 %v615_v27  ;;  %v525_v31 = vsel %vm92_vm0, %v616_v28, 0 }
 0x15c   :  { %666 = vmatprep.subr.bf16.mxu1 %v608_v58  ;;  %705 = vmatprep.subr.msk.bf16.mxu0 %vm92_vm0, %v616_v28 }
 0x15d   :  { %155 = vrot.lane.b32.xlu1 %v133_v30, %s728_s22  ;;  %v69_v30 = vpack.c.bf16 %v791_v4, %v784_v2  ;;  %690 = vmatprep.mubr.msk.bf16.mxu0 %vm450_vm5, %v68_v29 }
 0x15f   :  { %667 = vmatpush3.bf16.msra.mxu1 %v608_v58  ;;  %689 = vmatpush3.bf16.msra.mxu0 %v525_v31 }
 0x160   :  { %672 = vmatprep.subr.bf16.mxu1 %v846_v47 }
 0x163   :  { %691 = vmatmul.mubr.msk.bf16.vlgmr.msra.gmra.mrb[4].mxu0 %vm450_vm5, %v69_v30 }
 0x1c6   :  { %v158_v59 = vpop.permute.xlu0 %157 }
 0x1c7   :  { %v154_v54 = vpop.permute.xlu1 %153  ;;  %v167_v9 = vadd.f32 %v158_v59, %v784_v2 }
 0x1c8   :  { %v165_v61 = vadd.f32 %v154_v54, %v774_v0 }
 0x1cb   :  { %v160_v55 = vpop.permute.xlu1 %159 }
 0x1cc   :  { %v168_v13 = vadd.f32 %v160_v55, %v791_v4 }
 0x1cf   :  { %v156_v60 = vpop.permute.xlu1 %155 }
 0x1d0   :  { %v166_v5 = vadd.f32 %v156_v60, %v779_v1 }
 0x22d   :  { %v662_v34 = vpop.f32.mrb[0].mxu1 }
 0x22e   :  { %v228_v36 = vadd.f32 %v662_v34, %v147_v32  ;;  %v211_v37 = vpop.f32.mrb[1].mxu1 }
 0x22f   :  { %v226_v39 = vadd.f32 %v211_v37, %v145_v33  ;;  %234 = vrot.lane.b32.xlu0 %v211_v37, %s728_s22  ;;  %v663_v40 = vpop.f32.mrb[2].mxu1 }
 0x230   :  { %v252_v44 = vmul.f32 0.33333334, %v228_v36  ;;  %v229_v45 = vadd.f32 %v663_v40, %v148_v35  ;;  %v214_v46 = vpop.f32.mrb[3].mxu1 }
 0x231   :  { %v250_v49 = vmul.f32 0.33333334, %v226_v39  ;;  %v227_v50 = vadd.f32 %v214_v46, %v146_v38  ;;  %236 = vrot.lane.b32.xlu1 %v214_v46, %s728_s22 }
 0x232   :  { %256 = vst.msk [vmem:[%s984_s5 + $0x10] sm:$0xff] %vm61_vm1, %v252_v44  ;;  %v253_v51 = vmul.f32 0.33333334, %v229_v45 }
 0x233   :  { %254 = vst.msk [vmem:[%s984_s5] sm:$0xff] %vm61_vm1, %v250_v49  ;;  %v251_v53 = vmul.f32 0.33333334, %v227_v50  ;;  %238 = vrot.lane.b32.xlu0 %v662_v34, %s728_s22 }
 0x234   :  { %257 = vst.msk [vmem:[%s984_s5 + $0x18] sm:$0xff] %vm61_vm1, %v253_v51 }
 0x235   :  { %255 = vst.msk [vmem:[%s984_s5 + $0x8] sm:$0xff] %vm61_vm1, %v251_v53  ;;  %240 = vrot.lane.b32.xlu1 %v663_v40, %s728_s22 }
 0x236   :  { %v692_v4 = vpop.f32.mrb[4].mxu0 }
 0x237   :  { %v561_v35 = vpop.f32.mrb[5].mxu0 }
 0x238   :  { %v693_v36 = vpop.f32.mrb[6].mxu0 }
 0x239   :  { %v564_v37 = vpop.f32.mrb[7].mxu0 }
 0x2a1   :  { %v235_v62 = vpop.permute.xlu0 %234 }
 0x2a2   :  { %v246_v6 = vadd.f32 %v235_v62, %v165_v61 }
 0x2a3   :  { %v237_v8 = vpop.permute.xlu1 %236 }
 0x2a4   :  { %v247_v10 = vadd.f32 %v237_v8, %v166_v5  ;;  %v902_v14 = vmul.f32 0.33333334, %v246_v6 }
 0x2a5   :  { %v239_v12 = vpop.permute.xlu0 %238 }
 0x2a6   :  { %v904_v15 = vmul.f32 0.33333334, %v247_v10  ;;  %v248_v16 = vadd.f32 %v239_v12, %v167_v9 }
 0x2a7   :  { %v241_v17 = vpop.permute.xlu1 %240 }
 0x2a8   :  { %v264_v18 = vpack.c.bf16 %v904_v15, %v902_v14  ;;  %v249_v19 = vadd.f32 %v241_v17, %v168_v13  ;;  %v909_v20 = vmul.f32 0.33333334, %v248_v16 }
 0x2aa   :  { %v911_v21 = vmul.f32 0.33333334, %v249_v19  ;;  %268 = vrot.lane.b32.xlu0 %v264_v18, %s729_s1 }
 0x2ac   :  { %v265_v22 = vpack.c.bf16 %v911_v21, %v909_v20 }
 0x2ae   :  { %270 = vrot.lane.b32.xlu1 %v265_v22, %s729_s1 }
 0x31c   :  { %v269_v23 = vpop.permute.xlu0 %268 }
 0x31d   :  { %v275_v24 = vsel %vm272_vm3, %v262_v52, %v269_v23 }
 0x31e   :  { %668 = vmatprep.mubr.msk.bf16.mxu1 %vm291_vm4, %v275_v24 }
 0x320   :  { %v271_v25 = vpop.permute.xlu1 %270 }
 0x321   :  { %v278_v26 = vsel %vm272_vm3, %v263_v11, %v271_v25 }
 0x322   :  { %669 = vmatmul.mubr.msk.bf16.vlgmr.msra.gmra.mrb[4].mxu1 %vm291_vm4, %v278_v26 }
 0x323   :  { %673 = vmatpush3.bf16.msra.mxu1 %v846_v47 }
 0x324   :  { %674 = vmatprep.subr.bf16.mxu1 %v608_v58 }
 0x327   :  { %675 = vmatpush3.bf16.msra.mxu1 %v608_v58 }
 0x3f5   :  { %v670_v32 = vpop.f32.mrb[4].mxu1 }
 0x3f6   :  { %353 = vrot.lane.b32.xlu0 %v670_v32, %s730_s3  ;;  %v330_v33 = vpop.f32.mrb[5].mxu1 }
 0x3f7   :  { %v671_v34 = vpop.f32.mrb[6].mxu1 }
 0x3f8   :  { %v366_v0 = vpack.c.bf16 %v671_v34, %v670_v32  ;;  %355 = vrot.lane.b32.xlu1 %v671_v34, %s730_s3  ;;  %v333_v1 = vpop.f32.mrb[7].mxu1 }
 0x3f9   :  { %v365_v2 = vpack.c.bf16 %v333_v1, %v330_v33 }
 0x3fa   :  { %349 = vrot.lane.b32.xlu0 %v330_v33, %s730_s3 }
 0x3fb   :  { %676 = vmatprep.mubr.msk.bf16.mxu1 %vm291_vm4, %v365_v2 }
 0x3fc   :  { %351 = vrot.lane.b32.xlu1 %v333_v1, %s730_s3  ;;  %677 = vmatmul.mubr.msk.bf16.vlgmr.msra.gmra.mrb[8].mxu1 %vm291_vm4, %v366_v0 }
 0x468   :  { %v354_v54 = vpop.permute.xlu0 %353 }
 0x46a   :  { %v356_v55 = vpop.permute.xlu1 %355 }
 0x46b   :  { %v364_v7 = vadd.f32 %v356_v55, %v911_v21 }
 0x46c   :  { %v350_v56 = vpop.permute.xlu0 %349 }
 0x46d   :  { %v361_v58 = vadd.f32 %v350_v56, %v902_v14 }
 0x46e   :  { %v352_v57 = vpop.permute.xlu1 %351 }
 0x46f   :  { %v362_v60 = vadd.f32 %v352_v57, %v904_v15 }
 0x4cf   :  { %v678_v38 = vpop.f32.mrb[8].mxu1 }
 0x4d0   :  { %v444_v39 = vadd.f32 %v678_v38, %v889_v63  ;;  %v407_v40 = vpop.f32.mrb[9].mxu1  ;;  %v363_v63 = vadd.f32 %v354_v54, %v909_v20 }
 0x4d1   :  { %v442_v41 = vadd.f32 %v407_v40, %v843_v43  ;;  %426 = vrot.lane.b32.xlu0 %v407_v40, %s730_s3  ;;  %v679_v42 = vpop.f32.mrb[10].mxu1 }
 0x4d2   :  { %v694_v44 = vadd.f32 %v692_v4, %v444_v39  ;;  %v445_v45 = vadd.f32 %v679_v42, %v894_v3  ;;  %v410_v46 = vpop.f32.mrb[11].mxu1 }
 0x4d3   :  { %v443_v47 = vadd.f32 %v410_v46, %v851_v48  ;;  %v695_v49 = vadd.f32 %v561_v35, %v442_v41  ;;  %428 = vrot.lane.b32.xlu1 %v410_v46, %s730_s3 }
 0x4d4   :  { %v582_v50 = vmul.f32 0.33333334, %v694_v44  ;;  %v696_v51 = vadd.f32 %v693_v36, %v445_v45 }
 0x4d5   :  { %v580_v52 = vmul.f32 0.33333334, %v695_v49  ;;  %v697_v53 = vadd.f32 %v564_v37, %v443_v47  ;;  %430 = vrot.lane.b32.xlu0 %v678_v38, %s730_s3 }
 0x4d6   :  { %586 = vst.msk [vmem:[%s985_s6 + $0x10] sm:$0xff] %vm272_vm3, %v582_v50  ;;  %v583_v43 = vmul.f32 0.33333334, %v696_v51 }
 0x4d7   :  { %584 = vst.msk [vmem:[%s985_s6] sm:$0xff] %vm272_vm3, %v580_v52  ;;  %v581_v48 = vmul.f32 0.33333334, %v697_v53  ;;  %432 = vrot.lane.b32.xlu1 %v679_v42, %s730_s3 }
 0x4d8   :  { %587 = vst.msk [vmem:[%s985_s6 + $0x18] sm:$0xff] %vm272_vm3, %v583_v43 }
 0x4d9   :  { %585 = vst.msk [vmem:[%s985_s6 + $0x8] sm:$0xff] %vm272_vm3, %v581_v48 }
 0x543   :  { %v427_v59 = vpop.permute.xlu0 %426 }
 0x544   :  { %v438_v61 = vadd.f32 %v427_v59, %v361_v58 }
 0x545   :  { %v429_v62 = vpop.permute.xlu1 %428 }
 0x546   :  { %v446_v3 = vmul.f32 0.33333334, %v438_v61  ;;  %v439_v5 = vadd.f32 %v429_v62, %v362_v60 }
 0x547   :  { %v431_v6 = vpop.permute.xlu0 %430 }
 0x548   :  { %451 = vst.msk [vmem:[%s986_s7] sm:$0xff] %vm450_vm5, %v446_v3  ;;  %v447_v8 = vmul.f32 0.33333334, %v439_v5  ;;  %v440_v9 = vadd.f32 %v431_v6, %v363_v63 }
 0x549   :  { %v433_v10 = vpop.permute.xlu1 %432 }
 0x54a   :  { %452 = vst.msk [vmem:[%s986_s7 + $0x8] sm:$0xff] %vm450_vm5, %v447_v8  ;;  %v448_v11 = vmul.f32 0.33333334, %v440_v9  ;;  %v441_v12 = vadd.f32 %v433_v10, %v364_v7 }
 0x54c   :  { %453 = vst.msk [vmem:[%s986_s7 + $0x10] sm:$0xff] %vm450_vm5, %v448_v11  ;;  %v449_v13 = vmul.f32 0.33333334, %v441_v12 }
 0x54e   :  { %454 = vst.msk [vmem:[%s986_s7 + $0x18] sm:$0xff] %vm450_vm5, %v449_v13 }

// kernel: hrdprec_forward.7
= control target key start
LH: loop header
LB: loop body
LE: loop exit
PB: predicated region body
PF: predicated region fallthrough
CT: control target
= control target key end

     0   :  { %vm37_vm0 = vcmask 1043456   ;;  %vm30_vm1 = vcmask 195584   ;;  %s250_s0 = inlined_call_operand.vmem [shape: bf16[24,24], index: 0, kind: input, shape index: {}]   ;;  %s251_s1 = inlined_call_operand.vmem [shape: f32[32,24], index: 1, kind: input, shape index: {}]   ;;  %s252_s2 = inlined_call_operand.vmem [shape: f32[32,24], index: 2, kind: output, shape index: {}]  }
   0x1   :  { %v195_v0 = vld [vmem:[%s250_s0] sm:$0xff]   ;;  %v196_v1 = vld [vmem:[%s250_s0 + $0x8] ss:$0 sps:$4 sm:$0xff]   ;;  %v17_v5 = vld [vmem:[%s251_s1 + $0x10] sm:$0xff] }
   0x2   :  { %v15_v2 = vld [vmem:[%s251_s1] sm:$0xff]  ;;  %177 = vmatprep.subr.bf16.mxu0 %v195_v0  ;;  %v16_v3 = vld [vmem:[%s251_s1 + $0x8] sm:$0xff]  ;;  %185 = vmatprep.subr.bf16.mxu1 %v195_v0  ;;  %v18_v6 = vld [vmem:[%s251_s1 + $0x18] sm:$0xff]  ;;  %v39_v7 = vsel %vm37_vm0, %v196_v1, 0 }
   0x3   :  { %178 = vmatpush3.bf16.msra.mxu0 %v195_v0  ;;  %v19_v4 = vpack.c.bf16 %v16_v3, %v15_v2  ;;  %186 = vmatpush3.bf16.msra.mxu1 %v195_v0  ;;  %v20_v8 = vpack.c.bf16 %v18_v6, %v17_v5 }
   0x4   :  { %193 = vmatprep.subr.msk.bf16.mxu0 %vm37_vm0, %v196_v1  ;;  %194 = vmatprep.subr.msk.bf16.mxu1 %vm37_vm0, %v196_v1 }
   0x5   :  { %181 = vmatprep.mubr.msk.bf16.mxu0 %vm30_vm1, %v19_v4 }
   0x7   :  { %180 = vmatpush3.bf16.msra.mxu0 %v39_v7  ;;  %188 = vmatpush3.bf16.msra.mxu1 %v39_v7 }
   0xa   :  { %182 = vmatmul.mubr.msk.bf16.vlgmr.msra.gmra.mrb[0].mxu0 %vm30_vm1, %v20_v8 }
  0xdd   :  { %v183_v9 = vpop.f32.mrb[0].mxu0 }
  0xde   :  { %v75_v10 = vpop.f32.mrb[1].mxu0  ;;  %v92_v15 = vadd.f32 %v183_v9, %v17_v5 }
  0xdf   :  { %v184_v11 = vpop.f32.mrb[2].mxu0  ;;  %v90_v16 = vadd.f32 %v75_v10, %v15_v2 }
  0xe0   :  { %v95_v12 = vpack.c.bf16 %v184_v11, %v183_v9  ;;  %v78_v13 = vpop.f32.mrb[3].mxu0  ;;  %v93_v18 = vadd.f32 %v184_v11, %v18_v6 }
  0xe1   :  { %v94_v14 = vpack.c.bf16 %v78_v13, %v75_v10  ;;  %v91_v21 = vadd.f32 %v78_v13, %v16_v3 }
  0xe3   :  { %189 = vmatprep.mubr.msk.bf16.mxu1 %vm30_vm1, %v94_v14 }
  0xe4   :  { %190 = vmatmul.mubr.msk.bf16.vlgmr.msra.gmra.mrb[0].mxu1 %vm30_vm1, %v95_v12 }
 0x1b7   :  { %v191_v17 = vpop.f32.mrb[0].mxu1 }
 0x1b8   :  { %v153_v19 = vadd.f32 %v191_v17, %v92_v15  ;;  %v136_v20 = vpop.f32.mrb[1].mxu1 }
 0x1b9   :  { %v151_v22 = vadd.f32 %v136_v20, %v90_v16  ;;  %v192_v23 = vpop.f32.mrb[2].mxu1 }
 0x1ba   :  { %157 = vst.msk [vmem:[%s252_s2 + $0x10] sm:$0xff] %vm30_vm1, %v153_v19  ;;  %v154_v24 = vadd.f32 %v192_v23, %v93_v18  ;;  %v139_v25 = vpop.f32.mrb[3].mxu1 }
 0x1bb   :  { %155 = vst.msk [vmem:[%s252_s2] sm:$0xff] %vm30_vm1, %v151_v22  ;;  %v152_v26 = vadd.f32 %v139_v25, %v91_v21 }
 0x1bc   :  { %158 = vst.msk [vmem:[%s252_s2 + $0x18] sm:$0xff] %vm30_vm1, %v154_v24 }
 0x1bd   :  { %156 = vst.msk [vmem:[%s252_s2 + $0x8] sm:$0xff] %vm30_vm1, %v152_v26 }

// kernel: hrdprec_forward.9
= control target key start
LH: loop header
LB: loop body
LE: loop exit
PB: predicated region body
PF: predicated region fallthrough
CT: control target
= control target key end

     0   :  { %v173_v0 = vmov 0.0|0.0   ;;  %vm174_vm0 = vmmov 0   ;;  %v175_v4 = vmov 0.0   ;;  %vm38_vm1 = vcmask 261120   ;;  %s241_s2 = inlined_call_operand.vmem [shape: f32[32,8], index: 2, kind: input, shape index: {}]   ;;  %s242_s0 = inlined_call_operand.vmem [shape: f32[4,32], index: 0, kind: input, shape index: {}]   ;;  %s243_s1 = inlined_call_operand.vmem [shape: f32[4,32], index: 1, kind: input, shape index: {}]   ;;  %s244_s3 = inlined_call_operand.vmem [shape: f32[1,8], index: 3, kind: input, shape index: {}]   ;;  %s245_s4 = inlined_call_operand.vmem [shape: f32[1,8], index: 4, kind: input, shape index: {}]   ;;  %s246_s5 = inlined_call_operand.<no memory space> [shape: f32[1], index: 5, kind: input, shape index: {}]   ;;  %s247_s6 = inlined_call_operand.vmem [shape: f32[4,1], index: 6, kind: output, shape index: {}]  }
   0x1   :  { %160 = vmatprep.subr.bf16.mxu0 %v173_v0  ;;  %v27_v1 = vld [vmem:[%s241_s2] sm:$0xff]  ;;  %v28_v2 = vld [vmem:[%s241_s2 + $0x8] sm:$0xff]  ;;  %v29_v3 = vld [vmem:[%s241_s2 + $0x10] sm:$0xff]  ;;  %157 = vmatprep.mubr.msk.f32.mxu0 %vm174_vm0, %v175_v4  ;;  %vm121_vm2 = vcmask 60416   ;;  %v126_v19 = vstv %s246_s5  ;;  %vm134_vm3 = vcmask 3072  }
   0x2   :  { %v161_v5 = vpack.c.bf16 %v28_v2, %v27_v1  ;;  %v30_v6 = vld [vmem:[%s241_s2 + $0x18] sm:$0xff]  ;;  %v24_v8 = vld [vmem:[%s242_s0] sm:$0xf] }
   0x3   :  { %v164_v7 = vpack.c.bf16 %v30_v6, %v29_v3  ;;  %v25_v9 = vld [vmem:[%s243_s1] sm:$0xf] }
   0x4   :  { %162 = vmatpush3.bf16.msra.mxu0 %v161_v5  ;;  %v26_v10 = vmul.f32 %v25_v9, %v24_v8  ;;  %v140_v11 = vld [vmem:[%s244_s3] ss:$0 sm:$0xff] }
   0x5   :  { %163 = vmatprep.subr.bf16.mxu0 %v173_v0  ;;  %v142_v15 = vld [vmem:[%s245_s4] ss:$0 sm:$0xff] }
   0x8   :  { %165 = vmatpush3.bf16.msra.mxu0 %v164_v7 }
   0xb   :  { %158 = vmatmul.mubr.msk.f32.vlgmr.msra.gmra.mrb[0].mxu0 %vm38_vm1, %v26_v10 }
  0xde   :  { %v108_v12 = vpop.f32.mrb[0].mxu0 }
  0xdf   :  { %v109_v13 = vadd.f32 %v140_v11, %v108_v12  ;;  %v159_v14 = vpop.f32.mrb[1].mxu0 }
  0xe1   :  { %v112_v16 = vmax.f32 %v109_v13, 0.0 }
  0xe3   :  { %v120_v17 = vmul.f32 %v142_v15, %v112_v16 }
  0xe5   :  { %v122_v18 = vsel %vm121_vm2, %v120_v17, 0.0 }
  0xe6   :  { %123 = vadd.xlane.f32.xlu0 %v122_v18 }
 0x173   :  { %v124_v20 = vpop.xlane.xlu0 %123 }
 0x174   :  { %v127_v21 = vadd.f32 %v126_v19, %v124_v20 }
 0x176   :  { %v143_v22 = vmul.f32 -1.442695, %v127_v21 }
 0x178   :  { %169 = vpow2.f32 %v143_v22 }
 0x182   :  { %v170_v23 = vpop.eup %169 }
 0x183   :  { %v131_v24 = vadd.f32 1.0, %v170_v23 }
 0x185   :  { %171 = vrcp.f32 %v131_v24 }
 0x18f   :  { %v172_v25 = vpop.eup %171 }
 0x190   :  { %135 = vst.msk [vmem:[%s247_s6] sm:$0xf] %vm134_vm3, %v172_v25 }

</bundles_post_ra>
